<compile_context>
chip_gen: v7x
topology: tpu7x:2x2x1
jax: 0.10.0
libtpu: 0.0.40
codegen_flags: <defaults>
</compile_context>

<pallas_src>
import functools

import jax
import jax.numpy as jnp
import numpy as np
from jax.experimental import pallas as pl
from jax.experimental.pallas import tpu as pltpu

# ------------------------- configuration (small shapes) -------------------------
TIMESTEPS = 100
IMAGE_SIZE = 16
IN_CHANNELS = 4
HIDDEN = 32       # hidden width of the synthetic denoiser
T_EMB = 32        # sinusoidal time-embedding dim
BATCH = 2


# ------------------------- diffusion buffers (glue, plain JAX) ------------------
def linear_beta_schedule(timesteps, beta_start=1e-4, beta_end=0.02):
    return jnp.linspace(beta_start, beta_end, timesteps, dtype=jnp.float32)


def make_buffers(timesteps):
    betas = linear_beta_schedule(timesteps)
    alphas = 1.0 - betas
    alphas_cumprod = jnp.cumprod(alphas)
    return {
        "betas": betas,
        "alphas_cumprod": alphas_cumprod,
        "sqrt_alphas_cumprod": jnp.sqrt(alphas_cumprod),
        "sqrt_one_minus_alphas_cumprod": jnp.sqrt(1.0 - alphas_cumprod),
    }


def sinusoidal_embedding(t, dim):
    half = dim // 2
    freqs = jnp.exp(
        -jnp.log(10000.0) * jnp.arange(half, dtype=jnp.float32) / (half - 1)
    )
    args = t.astype(jnp.float32)[:, None] * freqs[None, :]
    return jnp.concatenate([jnp.sin(args), jnp.cos(args)], axis=-1)  # (B, dim)


# ------------------------- synthetic denoiser parameters ------------------------
def init_model_params(key):
    k1, k2, k3 = jax.random.split(key, 3)
    w1 = jax.random.normal(k1, (IN_CHANNELS, HIDDEN), jnp.float32) / np.sqrt(IN_CHANNELS)
    b1 = jnp.zeros((1, HIDDEN), jnp.float32)
    wt = jax.random.normal(k2, (T_EMB, HIDDEN), jnp.float32) / np.sqrt(T_EMB)
    bt = jnp.zeros((1, HIDDEN), jnp.float32)
    w2 = jax.random.normal(k3, (HIDDEN, IN_CHANNELS), jnp.float32) / np.sqrt(HIDDEN)
    b2 = jnp.zeros((1, IN_CHANNELS), jnp.float32)
    return (w1, b1, wt, bt, w2, b2)


# ------------------------- Pallas kernel -----------------------------------------
def _diffusion_loss_kernel(sac_ref, somac_ref,              # SMEM (B,) f32 each
                           x_ref, noise_ref,                # VMEM (B, C, HW), lane = HW
                           tembT_ref,                       # VMEM (T_EMB, B)
                           w1t_ref, b1c_ref,                # (HIDDEN, C), (HIDDEN, 1)
                           wtt_ref, btc_ref,                # (HIDDEN, T_EMB), (HIDDEN, 1)
                           w2t_ref, b2c_ref,                # (C, HIDDEN), (C, 1)
                           loss_ref,                        # VMEM (1, 1) f32
                           *, inv_total):
    # Time-embedding MLP, computed ONCE for the whole batch (transposed so the
    # per-batch bias is a column slice — no in-kernel transpose needed).
    h_t = (jnp.dot(wtt_ref[...], tembT_ref[...],
                   preferred_element_type=jnp.float32) + btc_ref[...])   # (HIDDEN, B)
    h_t = h_t * jax.nn.sigmoid(h_t)                                      # SiLU

    # Static unroll over the tiny batch; HW stays on the lane axis throughout.
    sq_acc = None
    batch = x_ref.shape[0]
    for b in range(batch):
        xb = x_ref[b]                 # (C, HW)
        nb = noise_ref[b]             # (C, HW)

        # forward diffusion q_sample (per-batch scalars read from SMEM)
        x_noisy = sac_ref[b] * xb + somac_ref[b] * nb

        # layer 1: (HIDDEN, C) @ (C, HW) -> (HIDDEN, HW); K=4 is trivial MXU
        # work (a VPU broadcast-MAC alternative exists but the EUP SiLU below
        # is the binding unit either way).
        hb = (jnp.dot(w1t_ref[...], x_noisy, preferred_element_type=jnp.float32)
              + b1c_ref[...] + h_t[:, b:b + 1])                          # (HIDDEN, HW)
        hb = hb * jax.nn.sigmoid(hb)                                     # SiLU (EUP-bound)

        # layer 2: (C, HIDDEN) @ (HIDDEN, HW) -> (C, HW)
        pred = (jnp.dot(w2t_ref[...], hb, preferred_element_type=jnp.float32)
                + b2c_ref[...])

        d = nb - pred
        sq = d * d
        sq_acc = sq if sq_acc is None else sq_acc + sq                   # (C, HW)

    # MSE (mean reduction) — single dense reduce, single (1,1) store.
    loss_ref[...] = jnp.sum(sq_acc, keepdims=True) * inv_total


def pallas_diffusion_loss(x, noise, sac, somac, temb, params):
    """x, noise: (B, C, HW) f32; sac, somac: (B,) f32; temb: (B, T_EMB) f32."""
    w1, b1, wt, bt, w2, b2 = params
    B, C, HW = x.shape
    inv_total = 1.0 / float(B * HW * C)
    kernel = functools.partial(_diffusion_loss_kernel, inv_total=inv_total)

    # Wrapper-side layout plumbing (lane-dense transposed weights/embedding).
    tembT = temb.T                      # (T_EMB, B)
    w1t = w1.T                          # (HIDDEN, C)
    b1c = b1.reshape(HIDDEN, 1)         # (HIDDEN, 1)
    wtt = wt.T                          # (HIDDEN, T_EMB)
    btc = bt.reshape(HIDDEN, 1)         # (HIDDEN, 1)
    w2t = w2.T                          # (C, HIDDEN)
    b2c = b2.reshape(C, 1)              # (C, 1)

    smem = pl.BlockSpec(memory_space=pltpu.MemorySpace.SMEM)
    vmem = pl.BlockSpec(memory_space=pltpu.MemorySpace.VMEM)

    loss = pl.pallas_call(
        kernel,
        out_shape=jax.ShapeDtypeStruct((1, 1), jnp.float32),
        in_specs=[
            smem,   # sac   (B,)
            smem,   # somac (B,)
            vmem,   # x     (B, C, HW)
            vmem,   # noise (B, C, HW)
            vmem,   # tembT (T_EMB, B)
            vmem, vmem,   # w1t, b1c
            vmem, vmem,   # wtt, btc
            vmem, vmem,   # w2t, b2c
        ],
        out_specs=vmem,
    )(sac, somac, x, noise, tembT, w1t, b1c, wtt, btc, w2t, b2c)
    return loss[0, 0]


# ------------------------- pure-JAX reference (for sanity check) ----------------
def reference_loss(x, noise, sac, somac, temb, params):
    """x, noise: (B, C, HW)."""
    w1, b1, wt, bt, w2, b2 = params
    x_noisy = sac[:, None, None] * x + somac[:, None, None] * noise
    h_t = temb @ wt + bt
    h_t = h_t * jax.nn.sigmoid(h_t)                                   # (B, HIDDEN)
    h = jnp.einsum("bcp,ch->bhp", x_noisy, w1) + b1.T[None] + h_t[:, :, None]
    h = h * jax.nn.sigmoid(h)
    pred = jnp.einsum("bhp,hc->bcp", h, w2) + b2.T[None]
    return jnp.mean((noise - pred) ** 2)


# ------------------------- forward() wrapper -------------------------------------
def diffusion_forward(x_nchw, params, buffers, key):
    B, C, H, W = x_nchw.shape
    HW = H * W
    t_key, n_key = jax.random.split(key)

    # torch.randint / torch.randn_like  -> deterministic jax.random
    t = jax.random.randint(t_key, (B,), 0, TIMESTEPS)
    noise_nchw = jax.random.normal(n_key, x_nchw.shape, dtype=jnp.float32)

    # NCHW -> (B, C, HW): no transpose needed, HW (=256) lands on the lane axis.
    x = x_nchw.reshape(B, C, HW)
    noise = noise_nchw.reshape(B, C, HW)

    sac = buffers["sqrt_alphas_cumprod"][t]                 # (B,)
    somac = buffers["sqrt_one_minus_alphas_cumprod"][t]     # (B,)
    temb = sinusoidal_embedding(t, T_EMB)                   # (B, T_EMB)

    loss = pallas_diffusion_loss(x, noise, sac, somac, temb, params)
    ref = reference_loss(x, noise, sac, somac, temb, params)
    return loss, ref


if __name__ == "__main__":
    key = jax.random.PRNGKey(0)
    pkey, xkey, fkey = jax.random.split(key, 3)

    params = init_model_params(pkey)
    buffers = make_buffers(TIMESTEPS)
    x_nchw = jax.random.normal(
        xkey, (BATCH, IN_CHANNELS, IMAGE_SIZE, IMAGE_SIZE), dtype=jnp.float32
    )

    loss, ref = diffusion_forward(x_nchw, params, buffers, fkey)
    loss = jax.block_until_ready(loss)
    ref = jax.block_until_ready(ref)

    np.testing.assert_allclose(np.asarray(loss), np.asarray(ref), rtol=1e-2, atol=1e-4)
    print("KERNEL_OK")
</pallas_src>

<mosaic_0001>
module attributes {stable_mosaic.version = 11 : i64} {
  func.func @_diffusion_loss_kernel(%arg0: memref<2xf32, #tpu.memory_space<smem>>, %arg1: memref<2xf32, #tpu.memory_space<smem>>, %arg2: memref<2x4x256xf32, #tpu.memory_space<vmem>>, %arg3: memref<2x4x256xf32, #tpu.memory_space<vmem>>, %arg4: memref<32x2xf32, #tpu.memory_space<vmem>>, %arg5: memref<32x4xf32, #tpu.memory_space<vmem>>, %arg6: memref<32x1xf32, #tpu.memory_space<vmem>>, %arg7: memref<32x32xf32, #tpu.memory_space<vmem>>, %arg8: memref<32x1xf32, #tpu.memory_space<vmem>>, %arg9: memref<4x32xf32, #tpu.memory_space<vmem>>, %arg10: memref<4x1xf32, #tpu.memory_space<vmem>>, %arg11: memref<1x1xf32, #tpu.memory_space<vmem>>) attributes {dimension_semantics = [], scalar_prefetch = 0 : i64, scratch_operands = 0 : i64, tpu.core_type = #tpu.core_type<tc>} {
    %c0 = arith.constant 0 : index
    %c0_0 = arith.constant 0 : index
    %0 = vector.load %arg7[%c0, %c0_0] : memref<32x32xf32, #tpu.memory_space<vmem>>, vector<32x32xf32>
    %c0_1 = arith.constant 0 : index
    %c0_2 = arith.constant 0 : index
    %1 = vector.load %arg4[%c0_1, %c0_2] : memref<32x2xf32, #tpu.memory_space<vmem>>, vector<32x2xf32>
    %cst = arith.constant dense<0.000000e+00> : vector<32x2xf32>
    %2 = tpu.matmul %0, %1, %cst {dimension_numbers = #tpu.dot_dimension_numbers<[1], [0], [0], [1], [0, 0, 1, 1], [], []>} : vector<32x32xf32>, vector<32x2xf32>, vector<32x2xf32> -> vector<32x2xf32>
    %c0_3 = arith.constant 0 : index
    %c0_4 = arith.constant 0 : index
    %3 = vector.load %arg8[%c0_3, %c0_4] : memref<32x1xf32, #tpu.memory_space<vmem>>, vector<32x1xf32>
    %4 = vector.broadcast %3 : vector<32x1xf32> to vector<32x2xf32>
    %5 = arith.addf %2, %4 : vector<32x2xf32>
    %6 = arith.negf %5 : vector<32x2xf32>
    %7 = math.exp %6 : vector<32x2xf32>
    %cst_5 = arith.constant 1.000000e+00 : f32
    %8 = vector.broadcast %cst_5 : f32 to vector<32x2xf32>
    %9 = arith.addf %8, %7 : vector<32x2xf32>
    %10 = arith.divf %8, %9 : vector<32x2xf32>
    %11 = arith.mulf %5, %10 : vector<32x2xf32>
    %c0_6 = arith.constant 0 : index
    %c0_7 = arith.constant 0 : index
    %c0_8 = arith.constant 0 : index
    %12 = vector.load %arg2[%c0_6, %c0_7, %c0_8] : memref<2x4x256xf32, #tpu.memory_space<vmem>>, vector<1x4x256xf32>
    %13 = vector.shape_cast %12 : vector<1x4x256xf32> to vector<4x256xf32>
    %c0_9 = arith.constant 0 : index
    %c0_10 = arith.constant 0 : index
    %c0_11 = arith.constant 0 : index
    %14 = vector.load %arg3[%c0_9, %c0_10, %c0_11] : memref<2x4x256xf32, #tpu.memory_space<vmem>>, vector<1x4x256xf32>
    %15 = vector.shape_cast %14 : vector<1x4x256xf32> to vector<4x256xf32>
    %c0_12 = arith.constant 0 : index
    %16 = memref.load %arg0[%c0_12] : memref<2xf32, #tpu.memory_space<smem>>
    %17 = vector.broadcast %16 : f32 to vector<4x256xf32>
    %18 = arith.mulf %17, %13 : vector<4x256xf32>
    %c0_13 = arith.constant 0 : index
    %19 = memref.load %arg1[%c0_13] : memref<2xf32, #tpu.memory_space<smem>>
    %20 = vector.broadcast %19 : f32 to vector<4x256xf32>
    %21 = arith.mulf %20, %15 : vector<4x256xf32>
    %22 = arith.addf %18, %21 : vector<4x256xf32>
    %c0_14 = arith.constant 0 : index
    %c0_15 = arith.constant 0 : index
    %23 = vector.load %arg5[%c0_14, %c0_15] : memref<32x4xf32, #tpu.memory_space<vmem>>, vector<32x4xf32>
    %cst_16 = arith.constant dense<0.000000e+00> : vector<32x256xf32>
    %24 = tpu.matmul %23, %22, %cst_16 {dimension_numbers = #tpu.dot_dimension_numbers<[1], [0], [0], [1], [0, 0, 1, 1], [], []>} : vector<32x4xf32>, vector<4x256xf32>, vector<32x256xf32> -> vector<32x256xf32>
    %c0_17 = arith.constant 0 : index
    %c0_18 = arith.constant 0 : index
    %25 = vector.load %arg6[%c0_17, %c0_18] : memref<32x1xf32, #tpu.memory_space<vmem>>, vector<32x1xf32>
    %26 = vector.broadcast %25 : vector<32x1xf32> to vector<32x256xf32>
    %27 = arith.addf %24, %26 : vector<32x256xf32>
    %28 = vector.extract_strided_slice %11 {offsets = [0, 0], sizes = [32, 1], strides = [1, 1]} : vector<32x2xf32> to vector<32x1xf32>
    %29 = vector.broadcast %28 : vector<32x1xf32> to vector<32x256xf32>
    %30 = arith.addf %27, %29 : vector<32x256xf32>
    %31 = arith.negf %30 : vector<32x256xf32>
    %32 = math.exp %31 : vector<32x256xf32>
    %cst_19 = arith.constant 1.000000e+00 : f32
    %33 = vector.broadcast %cst_19 : f32 to vector<32x256xf32>
    %34 = arith.addf %33, %32 : vector<32x256xf32>
    %35 = arith.divf %33, %34 : vector<32x256xf32>
    %36 = arith.mulf %30, %35 : vector<32x256xf32>
    %c0_20 = arith.constant 0 : index
    %c0_21 = arith.constant 0 : index
    %37 = vector.load %arg9[%c0_20, %c0_21] : memref<4x32xf32, #tpu.memory_space<vmem>>, vector<4x32xf32>
    %cst_22 = arith.constant dense<0.000000e+00> : vector<4x256xf32>
    %38 = tpu.matmul %37, %36, %cst_22 {dimension_numbers = #tpu.dot_dimension_numbers<[1], [0], [0], [1], [0, 0, 1, 1], [], []>} : vector<4x32xf32>, vector<32x256xf32>, vector<4x256xf32> -> vector<4x256xf32>
    %c0_23 = arith.constant 0 : index
    %c0_24 = arith.constant 0 : index
    %39 = vector.load %arg10[%c0_23, %c0_24] : memref<4x1xf32, #tpu.memory_space<vmem>>, vector<4x1xf32>
    %40 = vector.broadcast %39 : vector<4x1xf32> to vector<4x256xf32>
    %41 = arith.addf %38, %40 : vector<4x256xf32>
    %42 = arith.subf %15, %41 : vector<4x256xf32>
    %43 = arith.mulf %42, %42 : vector<4x256xf32>
    %c1 = arith.constant 1 : index
    %c0_25 = arith.constant 0 : index
    %c0_26 = arith.constant 0 : index
    %44 = vector.load %arg2[%c1, %c0_25, %c0_26] : memref<2x4x256xf32, #tpu.memory_space<vmem>>, vector<1x4x256xf32>
    %45 = vector.shape_cast %44 : vector<1x4x256xf32> to vector<4x256xf32>
    %c1_27 = arith.constant 1 : index
    %c0_28 = arith.constant 0 : index
    %c0_29 = arith.constant 0 : index
    %46 = vector.load %arg3[%c1_27, %c0_28, %c0_29] : memref<2x4x256xf32, #tpu.memory_space<vmem>>, vector<1x4x256xf32>
    %47 = vector.shape_cast %46 : vector<1x4x256xf32> to vector<4x256xf32>
    %c1_30 = arith.constant 1 : index
    %48 = memref.load %arg0[%c1_30] : memref<2xf32, #tpu.memory_space<smem>>
    %49 = vector.broadcast %48 : f32 to vector<4x256xf32>
    %50 = arith.mulf %49, %45 : vector<4x256xf32>
    %c1_31 = arith.constant 1 : index
    %51 = memref.load %arg1[%c1_31] : memref<2xf32, #tpu.memory_space<smem>>
    %52 = vector.broadcast %51 : f32 to vector<4x256xf32>
    %53 = arith.mulf %52, %47 : vector<4x256xf32>
    %54 = arith.addf %50, %53 : vector<4x256xf32>
    %c0_32 = arith.constant 0 : index
    %c0_33 = arith.constant 0 : index
    %55 = vector.load %arg5[%c0_32, %c0_33] : memref<32x4xf32, #tpu.memory_space<vmem>>, vector<32x4xf32>
    %cst_34 = arith.constant dense<0.000000e+00> : vector<32x256xf32>
    %56 = tpu.matmul %55, %54, %cst_34 {dimension_numbers = #tpu.dot_dimension_numbers<[1], [0], [0], [1], [0, 0, 1, 1], [], []>} : vector<32x4xf32>, vector<4x256xf32>, vector<32x256xf32> -> vector<32x256xf32>
    %c0_35 = arith.constant 0 : index
    %c0_36 = arith.constant 0 : index
    %57 = vector.load %arg6[%c0_35, %c0_36] : memref<32x1xf32, #tpu.memory_space<vmem>>, vector<32x1xf32>
    %58 = vector.broadcast %57 : vector<32x1xf32> to vector<32x256xf32>
    %59 = arith.addf %56, %58 : vector<32x256xf32>
    %60 = vector.extract_strided_slice %11 {offsets = [0, 1], sizes = [32, 1], strides = [1, 1]} : vector<32x2xf32> to vector<32x1xf32>
    %61 = vector.broadcast %60 : vector<32x1xf32> to vector<32x256xf32>
    %62 = arith.addf %59, %61 : vector<32x256xf32>
    %63 = arith.negf %62 : vector<32x256xf32>
    %64 = math.exp %63 : vector<32x256xf32>
    %cst_37 = arith.constant 1.000000e+00 : f32
    %65 = vector.broadcast %cst_37 : f32 to vector<32x256xf32>
    %66 = arith.addf %65, %64 : vector<32x256xf32>
    %67 = arith.divf %65, %66 : vector<32x256xf32>
    %68 = arith.mulf %62, %67 : vector<32x256xf32>
    %c0_38 = arith.constant 0 : index
    %c0_39 = arith.constant 0 : index
    %69 = vector.load %arg9[%c0_38, %c0_39] : memref<4x32xf32, #tpu.memory_space<vmem>>, vector<4x32xf32>
    %cst_40 = arith.constant dense<0.000000e+00> : vector<4x256xf32>
    %70 = tpu.matmul %69, %68, %cst_40 {dimension_numbers = #tpu.dot_dimension_numbers<[1], [0], [0], [1], [0, 0, 1, 1], [], []>} : vector<4x32xf32>, vector<32x256xf32>, vector<4x256xf32> -> vector<4x256xf32>
    %c0_41 = arith.constant 0 : index
    %c0_42 = arith.constant 0 : index
    %71 = vector.load %arg10[%c0_41, %c0_42] : memref<4x1xf32, #tpu.memory_space<vmem>>, vector<4x1xf32>
    %72 = vector.broadcast %71 : vector<4x1xf32> to vector<4x256xf32>
    %73 = arith.addf %70, %72 : vector<4x256xf32>
    %74 = arith.subf %47, %73 : vector<4x256xf32>
    %75 = arith.mulf %74, %74 : vector<4x256xf32>
    %76 = arith.addf %43, %75 : vector<4x256xf32>
    %77 = vector.shape_cast %76 : vector<4x256xf32> to vector<1x4x256xf32>
    %cst_43 = arith.constant dense<0.000000e+00> : vector<1xf32>
    %78 = vector.multi_reduction <add>, %77, %cst_43 [1, 2] : vector<1x4x256xf32> to vector<1xf32>
    %79 = vector.shape_cast %78 : vector<1xf32> to vector<1x1x1xf32>
    %80 = vector.extract %79[0, 0, 0] : f32 from vector<1x1x1xf32>
    %81 = vector.broadcast %80 : f32 to vector<1x1xf32>
    %cst_44 = arith.constant 4.8828125E-4 : f32
    %82 = vector.broadcast %cst_44 : f32 to vector<1x1xf32>
    %83 = arith.mulf %81, %82 : vector<1x1xf32>
    %c0_45 = arith.constant 0 : index
    %c0_46 = arith.constant 0 : index
    %84 = vector.load %arg11[%c0_45, %c0_46] : memref<1x1xf32, #tpu.memory_space<vmem>>, vector<1x1xf32>
    tpu.vector_store %arg11[%c0_45, %c0_46], %83 {strides = array<i32>} : memref<1x1xf32, #tpu.memory_space<vmem>>, vector<1x1xf32>,
    return
  }
}

</mosaic_0001>

<bundles_post_ra>
// kernel: tpu_custom_call.1
= control target key start
LH: loop header
LB: loop body
LE: loop exit
PB: predicated region body
PF: predicated region fallthrough
CT: control target
= control target key end

     0   :  { %16 = vsyncpa [#allocation4], 0  ;;  %s1380_s0 = inlined_call_operand.vmem [shape: f32[2], index: 0, kind: input, shape index: {}]   ;;  %s1381_s1 = inlined_call_operand.vmem [shape: f32[2], index: 1, kind: input, shape index: {}]   ;;  %s1382_s2 = inlined_call_operand.vmem [shape: f32[2,4,256], index: 2, kind: input, shape index: {}]   ;;  %s1383_s3 = inlined_call_operand.vmem [shape: f32[2,4,256], index: 3, kind: input, shape index: {}]   ;;  %s1384_s4 = inlined_call_operand.vmem [shape: f32[32,2], index: 4, kind: input, shape index: {}]   ;;  %s1385_s5 = inlined_call_operand.vmem [shape: f32[32,4], index: 5, kind: input, shape index: {}]   ;;  %s1386_s6 = inlined_call_operand.vmem [shape: f32[32,1], index: 6, kind: input, shape index: {}]   ;;  %s1387_s7 = inlined_call_operand.vmem [shape: f32[32,32], index: 7, kind: input, shape index: {}]   ;;  %s1388_s8 = inlined_call_operand.vmem [shape: f32[32,1], index: 8, kind: input, shape index: {}]   ;;  %s1389_s9 = inlined_call_operand.vmem [shape: f32[4,32], index: 9, kind: input, shape index: {}]   ;;  %s1390_s10 = inlined_call_operand.vmem [shape: f32[4,1], index: 10, kind: input, shape index: {}]   ;;  %s1391_s11 = inlined_call_operand.hbm [shape: f32[1,1], index: 11, kind: output, shape index: {}]  }
   0x1   :  { %17 = vsyncpa [#allocation6], 0 }
   0x2   :  { %18 = vsyncpa [#allocation3], 0  ;;  %s25_s19 = sshll.u32 %s1380_s0, 4  ;;  %s35_s22 = sshll.u32 %s1381_s1, 4  ;;  %s26_s19 = int_to_ptr.vmem [resolvable:$true] %s25_s19  ;;  %s36_s22 = int_to_ptr.vmem [resolvable:$true] %s35_s22 }
   0x3   :  { %s1021_s23 = scalar_lea.vmem %s26_s19, 16  ;;  %p1026_p1 = scmp.lt.s32.totalorder %s26_s19, %s26_s19 }
   0x4   :  { %p1022_p0 = scmp.ne.s32.totalorder %s26_s19, %s1021_s23  ;;  %p1027_p2 = scmp.lt.s32.totalorder %s1021_s23, %s1021_s23 }
   0x6   :  { %p1028_p3 = por %p1027_p2, %p1026_p1 }
   0x8   :  { %p1029_p4 = pnand %p1028_p3, %p1022_p0 }
   0xa   :  { %1032 = shalt.err (!%p1029_p4)
}
   0xb   :  { %s1073_s24 = smov [#allocation2]   ;;  %s1033_s25 = scalar_lea.vmem %s36_s22, 16 }
   0xc   :  { %28 = dma.vmem_to_smem %s26_s19, 16, %s1073_s24, [#allocation4]  }
   0xd   :  { %p1034_p5 = scmp.ne.s32.totalorder %s36_s22, %s1033_s25  ;;  %p1038_p6 = scmp.lt.s32.totalorder %s36_s22, %s36_s22 }
   0xe   :  { %p1039_p7 = scmp.lt.s32.totalorder %s1033_s25, %s1033_s25 }
  0x10   :  { %p1040_p8 = por %p1039_p7, %p1038_p6 }
  0x12   :  { %p1041_p9 = pnand %p1040_p8, %p1034_p5 }
  0x14   :  { %1044 = shalt.err (!%p1041_p9)
}
  0x15   :  { %s1074_s0 = smov [#allocation5]  }
  0x16   :  { %38 = dma.vmem_to_smem %s36_s22, 16, %s1074_s0, [#allocation6]  }
  0x17   :  { %1067 = dma.done.wait [#allocation4], 16  }
  0x18   :  { %1068 = vsyncadd [#allocation4], 4294967280 }
  0x19   :  { %1069 = dma.done.wait [#allocation6], 16  }
  0x1a   :  { %1070 = vsyncadd [#allocation6], 4294967280 }
  0x1b   :  { %63 = sfence }
  0x1c   :  { %v68_v0 = vld [vmem:[%s1384_s4] sm:$0xff]  ;;  %v69_v1 = vld [vmem:[%s1384_s4 + $0x8] sm:$0xff]  ;;  %v70_v2 = vld [vmem:[%s1384_s4 + $0x10] sm:$0xff]  ;;  %vm96_vm0 = vcmask 261120   ;;  %s224_s12 = sld [smem:[#allocation2]]  ;;  %v1075_v7 = vmov 0.0  }
  0x1d   :  { %v902_v3 = vpack.c.bf16 %v69_v1, %v68_v0  ;;  %v71_v4 = vld [vmem:[%s1384_s4 + $0x18] sm:$0xff]  ;;  %v64_v5 = vld [vmem:[%s1387_s7] sm:$0xff]  ;;  %s227_s17 = sld [smem:[#allocation5]]  ;;  %343 = vmatprep.mubr.f32.mxu1 %v1075_v7  ;;  %s863_s18 = sld [smem:[#allocation2 + $0x1]]  ;;  %v1076_v9 = vmov 0   ;;  %v74_v13 = vld [vmem:[%s1388_s8 + $0x10] sm:$0xff] }
  0x1e   :  { %v906_v6 = vpack.c.bf16 %v71_v4, %v70_v2  ;;  %896 = vmatprep.mubr.msk.f32.mxu0 %vm96_vm0, %v64_v5  ;;  %v222_v8 = vld [vmem:[%s1382_s2] sm:$0xff]  ;;  %s864_s21 = sld [smem:[#allocation5 + $0x1]]  ;;  %934 = vset.pattern.permute.xlu0 %v1076_v9  ;;  %v861_v16 = vld [vmem:[%s1382_s2 + $0x8] sm:$0xff]  ;;  %v75_v21 = vld [vmem:[%s1388_s8 + $0x18] sm:$0xff]  ;;  %vm274_vm1 = vcmask 1043456   ;;  %vm261_vm2 = vcmask 31744  }
  0x1f   :  { %903 = vmatprep.subr.bf16.mxu0 %v902_v3  ;;  %v1169_v10 = vld [vmem:[%s1383_s3] sm:$0xff]  ;;  %935 = vset.pattern.permute.xlu1 %v1076_v9  ;;  %v73_v17 = vld [vmem:[%s1388_s8 + $0x8] sm:$0xff]  ;;  %v66_v22 = vld [vmem:[%s1387_s7 + $0x10] sm:$0xff]  ;;  %vm820_vm3 = vcmask 0  }
  0x20   :  { %905 = vmatpush3.bf16.msra.mxu0 %v902_v3  ;;  %v72_v11 = vld [vmem:[%s1388_s8] sm:$0xff]  ;;  %88 = vperm.xlu1 %935, %v74_v13   ;;  %v65_v18 = vld [vmem:[%s1387_s7 + $0x8] sm:$0xff]  ;;  %v67_v30 = vld [vmem:[%s1387_s7 + $0x18] sm:$0xff] }
  0x21   :  { %907 = vmatprep.subr.bf16.mxu0 %v906_v6  ;;  %78 = vperm.xlu0 %934, %v72_v11   ;;  %v1191_v20 = vld [vmem:[%s1383_s3 + $0x8] sm:$0xff]  ;;  %v235_v28 = vld [vmem:[%s1386_s6] sm:$0xff]  ;;  %v237_v35 = vld [vmem:[%s1386_s6 + $0x10] sm:$0xff] }
  0x22   :  { %v225_v12 = vstv %s224_s12  ;;  %v231_v31 = vld [vmem:[%s1385_s5] sm:$0xff]  ;;  %v236_v33 = vld [vmem:[%s1386_s6 + $0x8] sm:$0xff]  ;;  %v238_v37 = vld [vmem:[%s1386_s6 + $0x18] sm:$0xff] }
  0x23   :  { %v226_v14 = vmul.f32 %v225_v12, %v222_v8  ;;  %v228_v15 = vstv %s227_s17  ;;  %v544_v23 = vstv %s863_s18  ;;  %v232_v36 = vld [vmem:[%s1385_s5 + $0x8] sm:$0xff]  ;;  %v233_v38 = vld [vmem:[%s1385_s5 + $0x10] sm:$0xff] }
  0x24   :  { %909 = vmatpush3.bf16.msra.mxu0 %v906_v6  ;;  %v229_v19 = vmul.f32 %v228_v15, %v1169_v10  ;;  %v545_v25 = vmul.f32 %v861_v16, %v544_v23  ;;  %v547_v26 = vstv %s864_s21  ;;  %93 = vperm.xlu1 %935, %v75_v21   ;;  %v234_v39 = vld [vmem:[%s1385_s5 + $0x18] sm:$0xff] }
  0x25   :  { %83 = vperm.xlu0 %934, %v73_v17   ;;  %v548_v27 = vmul.f32 %v1191_v20, %v547_v26  ;;  %v1077_v26 = vmov 1  }
  0x26   :  { %v230_v24 = vadd.f32 %v229_v19, %v226_v14 }
  0x27   :  { %897 = vmatmul.mubr.msk.f32.vlgmr.msra.gmra.mrb[0].mxu0 %vm96_vm0, %v65_v18  ;;  %v549_v32 = vadd.f32 %v548_v27, %v545_v25 }
  0x28   :  { %v260_v29 = vcombine.high %v230_v24, %v230_v24  ;;  %899 = vmatprep.mubr.msk.f32.mxu0 %vm96_vm0, %v66_v22  ;;  %246 = vperm.xlu1 %935, %v236_v33  }
  0x29   :  { %241 = vperm.xlu0 %934, %v235_v28   ;;  %v551_v34 = vcombine.high %v549_v32, %v549_v32 }
  0x2a   :  { %846 = vmatprep.subr.msk.mxu1 %vm274_vm1, %v260_v29  ;;  %v453_v29 = vld [vmem:[%s1390_s10] sm:$0xf] }
  0x2b   :  { %847 = vmatpush1.msk.msra.mxu1 %vm274_vm1, %v230_v24  ;;  %900 = vmatmul.mubr.msk.f32.gmra.mrb[2].mxu0 %vm96_vm0, %v67_v30 }
  0x2c   :  { %848 = vmatmul.mubr.msk.f32.vlgmr.msra.gmra.mrb[0].mxu1 %vm261_vm2, %v231_v31  ;;  %865 = vmatprep.subr.msk.mxu1 %vm274_vm1, %v551_v34 }
  0x2d   :  { %349 = vmatprep.mubr.f32.mxu1 %v1075_v7  ;;  %866 = vmatpush1.msk.msra.mxu1 %vm274_vm1, %v549_v32 }
  0x2e   :  { %251 = vperm.xlu0 %934, %v237_v35   ;;  %526 = vmatprep.mubr.f32.mxu0 %v1075_v7 }
  0x2f   :  { %256 = vperm.xlu1 %935, %v238_v37  }
  0x30   :  { %849 = vmatmul.mubr.msk.f32.gmra.mrb[2].mxu1 %vm261_vm2, %v232_v36 }
  0x31   :  { %355 = vmatprep.mubr.f32.mxu1 %v1075_v7 }
  0x34   :  { %850 = vmatmul.mubr.msk.f32.gmra.mrb[4].mxu1 %vm261_vm2, %v233_v38 }
  0x35   :  { %361 = vmatprep.mubr.f32.mxu1 %v1075_v7 }
  0x38   :  { %851 = vmatmul.mubr.msk.f32.gmra.mrb[6].mxu1 %vm261_vm2, %v234_v39 }
  0x39   :  { %620 = vmatprep.mubr.f32.mxu1 %v1075_v7 }
  0x3c   :  { %867 = vmatmul.mubr.msk.f32.vlgmr.msra.gmra.mrb[8].mxu1 %vm261_vm2, %v231_v31 }
  0x3d   :  { %626 = vmatprep.mubr.f32.mxu1 %v1075_v7 }
  0x40   :  { %868 = vmatmul.mubr.msk.f32.gmra.mrb[10].mxu1 %vm261_vm2, %v232_v36 }
  0x41   :  { %632 = vmatprep.mubr.f32.mxu1 %v1075_v7 }
  0x44   :  { %869 = vmatmul.mubr.msk.f32.gmra.mrb[12].mxu1 %vm261_vm2, %v233_v38 }
  0x45   :  { %638 = vmatprep.mubr.f32.mxu1 %v1075_v7 }
  0x48   :  { %870 = vmatmul.mubr.msk.f32.gmra.mrb[14].mxu1 %vm261_vm2, %v234_v39 }
  0x9f   :  { %v89_v41 = vpop.permute.xlu1 %88 }
  0xa0   :  { %v79_v40 = vpop.permute.xlu0 %78 }
  0xa3   :  { %v94_v48 = vpop.permute.xlu1 %93 }
  0xa4   :  { %v84_v42 = vpop.permute.xlu0 %83 }
  0xa7   :  { %v247_v30 = vpop.permute.xlu1 %246 }
  0xa8   :  { %v242_v31 = vpop.permute.xlu0 %241 }
  0xad   :  { %v1275_v33 = vpop.permute.xlu0 %251 }
  0xae   :  { %v1273_v32 = vpop.permute.xlu1 %256 }
  0xfa   :  { %v898_v43 = vpop.f32.mrb[0].mxu0 }
  0xfb   :  { %v181_v44 = vadd.f32 %v898_v43, %v84_v42  ;;  %v175_v45 = vpop.f32.mrb[1].mxu0 }
  0xfc   :  { %v176_v46 = vadd.f32 %v175_v45, %v79_v40 }
  0xfd   :  { %v843_v47 = vmul.f32 -1.442695, %v181_v44 }
  0xfe   :  { %v842_v49 = vmul.f32 -1.442695, %v176_v46  ;;  %v901_v50 = vpop.f32.mrb[2].mxu0 }
  0xff   :  { %941 = vpow2.f32 %v843_v47  ;;  %v191_v51 = vadd.f32 %v901_v50, %v94_v48  ;;  %v1250_v52 = vpop.f32.mrb[0].mxu1  ;;  %v185_v53 = vpop.f32.mrb[3].mxu0 }
 0x100   :  { %943 = vpow2.f32 %v842_v49  ;;  %v186_v54 = vadd.f32 %v185_v53, %v89_v41  ;;  %v347_v55 = vpop.f32.mrb[1].mxu1  ;;  %v346_v36 = vadd.f32 %v1250_v52, %v242_v31 }
 0x101   :  { %v845_v56 = vmul.f32 -1.442695, %v191_v51  ;;  %v348_v37 = vadd.f32 %v347_v55, %v242_v31 }
 0x102   :  { %v844_v57 = vmul.f32 -1.442695, %v186_v54 }
 0x103   :  { %945 = vpow2.f32 %v845_v56  ;;  %v351_v58 = vpop.f32.mrb[2].mxu1 }
 0x104   :  { %947 = vpow2.f32 %v844_v57  ;;  %v353_v59 = vpop.f32.mrb[3].mxu1  ;;  %v352_v34 = vadd.f32 %v351_v58, %v247_v30 }
 0x105   :  { %v354_v35 = vadd.f32 %v353_v59, %v247_v30 }
 0x107   :  { %v1252_v60 = vpop.f32.mrb[4].mxu1 }
 0x108   :  { %v1254_v61 = vpop.f32.mrb[5].mxu1 }
 0x109   :  { %v942_v62 = vpop.eup %941 }
 0x10a   :  { %v944_v63 = vpop.eup %943  ;;  %v207_v0 = vadd.f32 1.0, %v942_v62 }
 0x10b   :  { %v206_v1 = vadd.f32 1.0, %v944_v63  ;;  %v363_v2 = vpop.f32.mrb[6].mxu1  ;;  %v358_v63 = vadd.f32 %v1252_v60, %v1275_v33 }
 0x10c   :  { %949 = vrcp.f32 %v207_v0  ;;  %v365_v3 = vpop.f32.mrb[7].mxu1  ;;  %v364_v43 = vadd.f32 %v363_v2, %v1273_v32 }
 0x10d   :  { %v946_v4 = vpop.eup %945  ;;  %951 = vrcp.f32 %v206_v1 }
 0x10e   :  { %v948_v5 = vpop.eup %947  ;;  %v209_v6 = vadd.f32 1.0, %v946_v4 }
 0x10f   :  { %v622_v8 = vpop.f32.mrb[8].mxu1  ;;  %v208_v12 = vadd.f32 1.0, %v948_v5  ;;  %v360_v5 = vadd.f32 %v1254_v61, %v1275_v33 }
 0x110   :  { %953 = vrcp.f32 %v209_v6  ;;  %v624_v11 = vpop.f32.mrb[9].mxu1  ;;  %v623_v50 = vadd.f32 %v622_v8, %v242_v31 }
 0x111   :  { %955 = vrcp.f32 %v208_v12  ;;  %v625_v53 = vadd.f32 %v624_v11, %v242_v31 }
 0x113   :  { %v1256_v13 = vpop.f32.mrb[10].mxu1 }
 0x114   :  { %v1258_v14 = vpop.f32.mrb[11].mxu1  ;;  %v629_v58 = vadd.f32 %v1256_v13, %v247_v30 }
 0x115   :  { %v631_v59 = vadd.f32 %v1258_v14, %v247_v30 }
 0x116   :  { %v950_v15 = vpop.eup %949 }
 0x117   :  { %v952_v16 = vpop.eup %951  ;;  %v219_v17 = vmul.f32 %v950_v15, %v181_v44  ;;  %v1260_v18 = vpop.f32.mrb[12].mxu1  ;;  %v366_v44 = vadd.f32 %v365_v3, %v1273_v32 }
 0x118   :  { %v218_v19 = vmul.f32 %v952_v16, %v176_v46  ;;  %v1262_v21 = vpop.f32.mrb[13].mxu1 }
 0x119   :  { %375 = vperm.xlu1 %935, %v219_v17  }
 0x11a   :  { %v954_v22 = vpop.eup %953  ;;  %370 = vperm.xlu0 %934, %v218_v19  }
 0x11b   :  { %v221_v23 = vmul.f32 %v954_v22, %v191_v51  ;;  %v1264_v24 = vpop.f32.mrb[14].mxu1  ;;  %v956_v27 = vpop.eup %955 }
 0x11c   :  { %v1266_v25 = vpop.f32.mrb[15].mxu1  ;;  %v220_v28 = vmul.f32 %v956_v27, %v186_v54 }
 0x11d   :  { %385 = vperm.xlu1 %935, %v221_v23  }
 0x11e   :  { %936 = vset.pattern.permute.xlu0 %v1077_v26 }
 0x11f   :  { %646 = vperm.xlu0 %936, %v218_v19  }
 0x121   :  { %937 = vset.pattern.permute.xlu1 %v1077_v26 }
 0x122   :  { %650 = vperm.xlu1 %937, %v219_v17   ;;  %v635_v17 = vadd.f32 %v1260_v18, %v1275_v33  ;;  %v637_v18 = vadd.f32 %v1262_v21, %v1275_v33 }
 0x123   :  { %938 = vset.pattern.permute.xlu0 %v1076_v9 }
 0x124   :  { %380 = vperm.xlu0 %938, %v220_v28  }
 0x126   :  { %654 = vperm.xlu1 %937, %v220_v28  }
 0x128   :  { %939 = vset.pattern.permute.xlu0 %v1077_v26 }
 0x129   :  { %658 = vperm.xlu0 %939, %v221_v23  }
 0x12a   :  { %940 = vset.pattern.permute.xlu1 %v1076_v9 }
 0x12b   :  { %456 = vperm.xlu1 %940, %v453_v29  }
 0x198   :  { %v376_v38 = vpop.permute.xlu1 %375 }
 0x199   :  { %v1278_v39 = vadd.f32 %v376_v38, %v352_v34  ;;  %v1280_v9 = vadd.f32 %v376_v38, %v354_v35  ;;  %v371_v40 = vpop.permute.xlu0 %370 }
 0x19a   :  { %v1282_v41 = vadd.f32 %v371_v40, %v346_v36  ;;  %v1284_v42 = vadd.f32 %v371_v40, %v348_v37  ;;  %v641_v40 = vadd.f32 %v1264_v24, %v1273_v32 }
 0x19b   :  { %v854_v45 = vmul.f32 -1.442695, %v1278_v39  ;;  %v855_v46 = vmul.f32 -1.442695, %v1280_v9 }
 0x19c   :  { %v852_v47 = vmul.f32 -1.442695, %v1282_v41  ;;  %v853_v48 = vmul.f32 -1.442695, %v1284_v42  ;;  %v386_v49 = vpop.permute.xlu1 %385 }
 0x19d   :  { %957 = vpow2.f32 %v854_v45  ;;  %v1292_v51 = vadd.f32 %v386_v49, %v364_v43  ;;  %v1294_v52 = vadd.f32 %v386_v49, %v366_v44  ;;  %v643_v45 = vadd.f32 %v1266_v25, %v1273_v32 }
 0x19e   :  { %959 = vpow2.f32 %v855_v46  ;;  %v647_v54 = vpop.permute.xlu0 %646 }
 0x19f   :  { %961 = vpow2.f32 %v852_v47  ;;  %v858_v55 = vmul.f32 -1.442695, %v1292_v51  ;;  %v859_v56 = vmul.f32 -1.442695, %v1294_v52  ;;  %v1298_v57 = vadd.f32 %v647_v54, %v623_v50 }
 0x1a0   :  { %963 = vpow2.f32 %v853_v48  ;;  %v1302_v62 = vadd.f32 %v647_v54, %v625_v53 }
 0x1a1   :  { %965 = vpow2.f32 %v858_v55  ;;  %v871_v0 = vmul.f32 -1.442695, %v1298_v57  ;;  %v651_v1 = vpop.permute.xlu1 %650 }
 0x1a2   :  { %967 = vpow2.f32 %v859_v56  ;;  %v872_v2 = vmul.f32 -1.442695, %v1302_v62  ;;  %v1308_v3 = vadd.f32 %v651_v1, %v629_v58  ;;  %v1310_v4 = vadd.f32 %v651_v1, %v631_v59 }
 0x1a3   :  { %969 = vpow2.f32 %v871_v0  ;;  %v381_v6 = vpop.permute.xlu0 %380 }
 0x1a4   :  { %971 = vpow2.f32 %v872_v2  ;;  %v873_v8 = vmul.f32 -1.442695, %v1308_v3  ;;  %v874_v60 = vmul.f32 -1.442695, %v1310_v4  ;;  %v1316_v11 = vadd.f32 %v381_v6, %v358_v63 }
 0x1a5   :  { %v1318_v12 = vadd.f32 %v381_v6, %v360_v5  ;;  %v655_v16 = vpop.permute.xlu1 %654 }
 0x1a6   :  { %973 = vpow2.f32 %v873_v8  ;;  %v856_v13 = vmul.f32 -1.442695, %v1316_v11  ;;  %v1324_v28 = vadd.f32 %v655_v16, %v635_v17  ;;  %v1333_v47 = vadd.f32 %v655_v16, %v637_v18 }
 0x1a7   :  { %v958_v14 = vpop.eup %957  ;;  %975 = vpow2.f32 %v874_v60  ;;  %v857_v15 = vmul.f32 -1.442695, %v1318_v12 }
 0x1a8   :  { %v960_v61 = vpop.eup %959  ;;  %v422_v19 = vadd.f32 1.0, %v958_v14  ;;  %977 = vpow2.f32 %v856_v13  ;;  %v659_v37 = vpop.permute.xlu0 %658  ;;  %v875_v44 = vmul.f32 -1.442695, %v1324_v28  ;;  %v876_v25 = vmul.f32 -1.442695, %v1333_v47 }
 0x1a9   :  { %v962_v22 = vpop.eup %961  ;;  %v423_v23 = vadd.f32 1.0, %v960_v61  ;;  %979 = vpow2.f32 %v857_v15  ;;  %v1335_v21 = vadd.f32 %v659_v37, %v641_v40  ;;  %v1337_v50 = vadd.f32 %v659_v37, %v643_v45 }
 0x1aa   :  { %v964_v26 = vpop.eup %963  ;;  %981 = vrcp.f32 %v422_v19  ;;  %v420_v27 = vadd.f32 1.0, %v962_v22 }
 0x1ab   :  { %v966_v29 = vpop.eup %965  ;;  %983 = vrcp.f32 %v423_v23  ;;  %v421_v30 = vadd.f32 1.0, %v964_v26  ;;  %v877_v58 = vmul.f32 -1.442695, %v1335_v21  ;;  %v878_v0 = vmul.f32 -1.442695, %v1337_v50 }
 0x1ac   :  { %v968_v31 = vpop.eup %967  ;;  %985 = vrcp.f32 %v420_v27  ;;  %v426_v34 = vadd.f32 1.0, %v966_v29 }
 0x1ad   :  { %v970_v35 = vpop.eup %969  ;;  %987 = vrcp.f32 %v421_v30  ;;  %v427_v36 = vadd.f32 1.0, %v968_v31 }
 0x1ae   :  { %v972_v38 = vpop.eup %971  ;;  %989 = vrcp.f32 %v426_v34  ;;  %v693_v43 = vadd.f32 1.0, %v970_v35 }
 0x1af   :  { %991 = vrcp.f32 %v427_v36  ;;  %v694_v46 = vadd.f32 1.0, %v972_v38 }
 0x1b0   :  { %v974_v48 = vpop.eup %973  ;;  %993 = vrcp.f32 %v693_v43 }
 0x1b1   :  { %v976_v33 = vpop.eup %975  ;;  %995 = vrcp.f32 %v694_v46  ;;  %v695_v49 = vadd.f32 1.0, %v974_v48 }
 0x1b2   :  { %v978_v24 = vpop.eup %977  ;;  %v696_v53 = vadd.f32 1.0, %v976_v33  ;;  %997 = vpow2.f32 %v875_v44 }
 0x1b3   :  { %v980_v54 = vpop.eup %979  ;;  %999 = vrcp.f32 %v695_v49  ;;  %v424_v55 = vadd.f32 1.0, %v978_v24  ;;  %v457_v24 = vpop.permute.xlu1 %456 }
 0x1b4   :  { %v982_v32 = vpop.eup %981  ;;  %1001 = vrcp.f32 %v696_v53  ;;  %v425_v56 = vadd.f32 1.0, %v980_v54 }
 0x1b5   :  { %v984_v59 = vpop.eup %983  ;;  %v446_v63 = vmul.f32 %v982_v32, %v1278_v39  ;;  %1003 = vrcp.f32 %v424_v55 }
 0x1b6   :  { %v986_v1 = vpop.eup %985  ;;  %v447_v2 = vmul.f32 %v984_v59, %v1280_v9  ;;  %1005 = vrcp.f32 %v425_v56 }
 0x1b7   :  { %v988_v5 = vpop.eup %987  ;;  %v444_v6 = vmul.f32 %v986_v1, %v1282_v41  ;;  %1007 = vpow2.f32 %v876_v25 }
 0x1b8   :  { %v990_v8 = vpop.eup %989  ;;  %v445_v60 = vmul.f32 %v988_v5, %v1284_v42  ;;  %1009 = vpow2.f32 %v877_v58 }
 0x1b9   :  { %v992_v13 = vpop.eup %991  ;;  %v912_v14 = vpack.c.bf16 %v446_v63, %v444_v6  ;;  %1011 = vpow2.f32 %v878_v0  ;;  %v450_v29 = vmul.f32 %v990_v8, %v1292_v51  ;;  %v452_v51 = vld [vmem:[%s1389_s9] sm:$0xf]  ;;  %s1078_s9 = smov [#allocation7]  }
 0x1ba   :  { %v994_v15 = vpop.eup %993  ;;  %v910_v39 = vpack.c.bf16 %v447_v2, %v445_v60  ;;  %v451_v35 = vmul.f32 %v992_v13, %v1294_v52  ;;  %s828_s30 = sshll.u32 %s1078_s9, 4  ;;  %s829_s30 = int_to_ptr.vmem [resolvable:$true] %s828_s30 }
 0x1bb   :  { %v996_v16 = vpop.eup %995  ;;  %v717_v19 = vmul.f32 %v994_v15, %v1298_v57  ;;  %s1045_s13 = scalar_lea.vmem %s829_s30, 16  ;;  %s1049_s14 = scalar_lea.vmem %s829_s30, 32 }
 0x1bc   :  { %v998_v61 = vpop.eup %997  ;;  %911 = vmatprep.subr.bf16.mxu0 %v910_v39  ;;  %v718_v23 = vmul.f32 %v996_v16, %v1302_v62  ;;  %p1046_p10 = scmp.ne.s32.totalorder %s829_s30, %s1045_s13  ;;  %p1050_p11 = scmp.lt.s32.totalorder %s829_s30, %s829_s30 }
 0x1bd   :  { %v1000_v17 = vpop.eup %999  ;;  %913 = vmatpush1.bf16.msra.mxu0 %v912_v14  ;;  %v697_v26 = vadd.f32 1.0, %v998_v61  ;;  %p1051_p12 = scmp.lt.s32.totalorder %s1049_s14, %s1045_s13 }
 0x1be   :  { %v1002_v9 = vpop.eup %1001  ;;  %v719_v41 = vmul.f32 %v1000_v17, %v1308_v3 }
 0x1bf   :  { %v1004_v22 = vpop.eup %1003  ;;  %v720_v42 = vmul.f32 %v1002_v9, %v1310_v4  ;;  %1013 = vrcp.f32 %v697_v26  ;;  %p1052_p13 = por %p1051_p12, %p1050_p11 }
 0x1c0   :  { %v1006_v27 = vpop.eup %1005  ;;  %v920_v30 = vpack.c.bf16 %v719_v41, %v717_v19  ;;  %v448_v31 = vmul.f32 %v1004_v22, %v1316_v11 }
 0x1c1   :  { %v1008_v34 = vpop.eup %1007  ;;  %v449_v18 = vmul.f32 %v1006_v27, %v1318_v12  ;;  %v918_v57 = vpack.c.bf16 %v720_v42, %v718_v23  ;;  %p1053_p0 = pnand %p1052_p13, %p1046_p10 }
 0x1c2   :  { %v1010_v36 = vpop.eup %1009  ;;  %v916_v3 = vpack.c.bf16 %v450_v29, %v448_v31  ;;  %v698_v37 = vadd.f32 1.0, %v1008_v34 }
 0x1c3   :  { %v1012_v38 = vpop.eup %1011  ;;  %v699_v62 = vadd.f32 1.0, %v1010_v36  ;;  %v914_v4 = vpack.c.bf16 %v451_v35, %v449_v18 }
 0x1c4   :  { %1015 = vrcp.f32 %v698_v37  ;;  %v700_v40 = vadd.f32 1.0, %v1012_v38 }
 0x1c5   :  { %1017 = vrcp.f32 %v699_v62  ;;  %915 = vmatprep.subr.bf16.mxu0 %v914_v4 }
 0x1c6   :  { %1019 = vrcp.f32 %v700_v40  ;;  %917 = vmatpush1.bf16.msra.mxu0 %v916_v3 }
 0x1c7   :  { %919 = vmatprep.subr.bf16.mxu0 %v918_v57 }
 0x1c9   :  { %860 = vmatmul.mubr.msk.f32.vlgmr.msra.gmra.mrb[4].mxu0 %vm96_vm0, %v452_v51  ;;  %v1014_v52 = vpop.eup %1013 }
 0x1ca   :  { %921 = vmatpush1.bf16.msra.mxu0 %v920_v30  ;;  %789 = vmatprep.mubr.f32.mxu0 %v1075_v7  ;;  %v721_v44 = vmul.f32 %v1014_v52, %v1324_v28 }
 0x1ce   :  { %v1016_v11 = vpop.eup %1015 }
 0x1cf   :  { %v1018_v12 = vpop.eup %1017  ;;  %v722_v46 = vmul.f32 %v1016_v11, %v1333_v47 }
 0x1d0   :  { %v1020_v43 = vpop.eup %1019  ;;  %v723_v45 = vmul.f32 %v1018_v12, %v1335_v21 }
 0x1d1   :  { %v724_v48 = vmul.f32 %v1020_v43, %v1337_v50 }
 0x1d2   :  { %v924_v33 = vpack.c.bf16 %v723_v45, %v721_v44 }
 0x1d3   :  { %v922_v49 = vpack.c.bf16 %v724_v48, %v722_v46 }
 0x1d5   :  { %923 = vmatprep.subr.bf16.mxu0 %v922_v49 }
 0x1d6   :  { %925 = vmatpush1.bf16.msra.mxu0 %v924_v33 }
 0x1d9   :  { %879 = vmatmul.mubr.msk.f32.vlgmr.msra.gmra.mrb[6].mxu0 %vm96_vm0, %v452_v51 }
 0x29c   :  { %v528_v7 = vpop.f32.mrb[4].mxu0 }
 0x29d   :  { %v529_v53 = vadd.f32 %v528_v7, %v457_v24  ;;  %v530_v54 = vpop.f32.mrb[5].mxu0 }
 0x29e   :  { %v531_v55 = vadd.f32 %v530_v54, %v457_v24 }
 0x2a0   :  { %v535_v25 = vcombine.low %v529_v53, %v531_v55 }
 0x2a2   :  { %v537_v47 = vsub.f32 %v1169_v10, %v535_v25 }
 0x2a4   :  { %v538_v59 = vmul.f32 %v537_v47, %v537_v47 }
 0x2ac   :  { %v791_v32 = vpop.f32.mrb[6].mxu0 }
 0x2ad   :  { %v792_v28 = vadd.f32 %v791_v32, %v457_v24  ;;  %v793_v56 = vpop.f32.mrb[7].mxu0 }
 0x2ae   :  { %v794_v21 = vadd.f32 %v793_v56, %v457_v24 }
 0x2b0   :  { %v798_v58 = vcombine.low %v792_v28, %v794_v21 }
 0x2b2   :  { %v800_v50 = vsub.f32 %v1191_v20, %v798_v58 }
 0x2b4   :  { %v801_v63 = vmul.f32 %v800_v50, %v800_v50 }
 0x2b6   :  { %v802_v0 = vadd.f32 %v801_v63, %v538_v59 }
 0x2b8   :  { %v804_v1 = vcombine.high %v802_v0, %v802_v0  ;;  %v806_v2 = vsel %vm274_vm1, %v802_v0, 0.0 }
 0x2ba   :  { %v807_v5 = vsel %vm274_vm1, %v804_v1, 0.0 }
 0x2bb   :  { %v808_v6 = vadd.f32 %v807_v5, %v806_v2 }
 0x2bd   :  { %809 = vadd.xlane.f32.xlu0 %v808_v6 }
 0x34a   :  { %v810_v8 = vpop.xlane.xlu0 %809 }
 0x34b   :  { %v811_v60 = vrot.slane %v810_v8, 4 }
 0x34d   :  { %v812_v13 = vadd.f32 %v811_v60, %v810_v8 }
 0x34f   :  { %v813_v14 = vrot.slane %v812_v13, 2 }
 0x351   :  { %v814_v15 = vadd.f32 %v813_v14, %v812_v13 }
 0x353   :  { %v815_v39 = vrot.slane %v814_v15, 1 }
 0x355   :  { %v816_v10 = vadd.f32 %v815_v39, %v814_v15 }
 0x357   :  { %926 = vpush %v816_v10 }
 0x388   :  { %s927_s12 = spop %926 }
 0x389   :  { %v818_v20 = vstv %s927_s12 }
 0x38a   :  { %v819_v16 = vmul.f32 0.00048828125, %v818_v20 }
 0x38c   :  { %821 = vst.msk [vmem:[#allocation7] sm:$0x1] %vm820_vm3, %v819_v16 }
 0x38d   :  { %1056 = shalt.err (!%p1053_p0)
}
 0x38e   :  { %s1057_s16 = scalar_lea.hbm %s1391_s11, 16 }
 0x38f   :  { %p1058_p1 = scmp.ne.s32.totalorder %s1391_s11, %s1057_s16  ;;  %p1061_p2 = scmp.lt.u32.totalorder %s1057_s16, %s1391_s11 }
 0x391   :  { %p1063_p3 = pnand %p1061_p2, %p1058_p1 }
 0x393   :  { %1066 = shalt.err (!%p1063_p3)
}
 0x394   :  { %831 = dma.vmem_to_hbm [thread:$0]  %s829_s30, 16, %s1391_s11, [#allocation3]  }
 0x395   :  { %1071 = dma.done.wait [#allocation3], 16  }
 0x396   :  { %1072 = vsyncadd [#allocation3], 4294967280 }
 0x397   :  { %835 = vsyncpa [#allocation3], 1 }
 0x398   :  { %836 = vsyncpa [#allocation4], 1 }
 0x399   :  { %837 = vsyncpa [#allocation6], 1 }

</bundles_post_ra>
